<compile_context>
chip_gen: v6e
topology: v6e:2x2x1
jax: 0.10.0
libtpu: 0.0.40
codegen_flags: <defaults>
</compile_context>

<pallas_src>
import jax
import jax.numpy as jnp
from jax.experimental import pallas as pl
from jax.experimental.pallas import tpu as pltpu


def linear_kernel(x_ref, w_ref, b_ref, o_ref):
    # x_ref: (M, K), w_ref: (K, N) pre-transposed, b_ref: (1, N), o_ref: (M, N)
    acc = jnp.dot(
        x_ref[...],
        w_ref[...],
        preferred_element_type=jnp.float32,
    )
    o_ref[...] = (acc + b_ref[...]).astype(o_ref.dtype)


def prepare_params(weight, bias):
    """One-time parameter prep (constant-folded under jit / done at load time).

    weight: (N, K) PyTorch layout  ->  (K, N)
    bias:   (N,)                   ->  (1, N)
    """
    return weight.T, bias.reshape(1, -1)


def linear(x, w_kn, b2):
    """x: (M, K) f32, w_kn: (K, N) f32 (pre-transposed), b2: (1, N) f32."""
    M, K = x.shape
    K2, N = w_kn.shape
    assert K == K2
    assert b2.shape == (1, N)

    cost = pl.CostEstimate(
        flops=2 * M * N * K,
        bytes_accessed=4 * (M * K + K * N + N + M * N),
        transcendentals=0,
    )

    return pl.pallas_call(
        linear_kernel,
        out_shape=jax.ShapeDtypeStruct((M, N), x.dtype),
        in_specs=[
            pl.BlockSpec(memory_space=pltpu.MemorySpace.VMEM),
            pl.BlockSpec(memory_space=pltpu.MemorySpace.VMEM),
            pl.BlockSpec(memory_space=pltpu.MemorySpace.VMEM),
        ],
        out_specs=pl.BlockSpec(memory_space=pltpu.MemorySpace.VMEM),
        cost_estimate=cost,
    )(x, w_kn, b2)


if __name__ == "__main__":
    key = jax.random.PRNGKey(0)
    kx, kw, kb = jax.random.split(key, 3)

    # Module: torch.nn.Linear(32, 16, bias=True); input: (8, 32)
    M, K, N = 8, 32, 16
    x = jax.random.uniform(kx, (M, K), dtype=jnp.float32)
    # Deterministic parameter init (mimics kaiming-uniform-ish range, synthetic).
    bound = 1.0 / (K ** 0.5)
    weight = jax.random.uniform(kw, (N, K), minval=-bound, maxval=bound,
                                dtype=jnp.float32)   # PyTorch (out, in) layout
    bias = jax.random.uniform(kb, (N,), minval=-bound, maxval=bound,
                              dtype=jnp.float32)

    # One-time prep: weight -> (K, N), bias -> (1, N).
    w_kn, b2 = prepare_params(weight, bias)

    out = linear(x, w_kn, b2)
    out = jax.block_until_ready(out)

    # Correctness check against plain-JAX reference (original PyTorch semantics).
    ref = x @ weight.T + bias
    assert out.shape == (M, N)
    assert jnp.allclose(out, ref, atol=1e-5, rtol=1e-5)

    print("KERNEL_OK")
</pallas_src>

<mosaic_0001>
module attributes {stable_mosaic.version = 11 : i64} {
  func.func @linear_kernel(%arg0: memref<8x32xf32, #tpu.memory_space<vmem>>, %arg1: memref<32x16xf32, #tpu.memory_space<vmem>>, %arg2: memref<1x16xf32, #tpu.memory_space<vmem>>, %arg3: memref<8x16xf32, #tpu.memory_space<vmem>>) attributes {dimension_semantics = [], scalar_prefetch = 0 : i64, scratch_operands = 0 : i64, tpu.core_type = #tpu.core_type<tc>} {
    %c0 = arith.constant 0 : index
    %c0_0 = arith.constant 0 : index
    %0 = vector.load %arg0[%c0, %c0_0] : memref<8x32xf32, #tpu.memory_space<vmem>>, vector<8x32xf32>
    %c0_1 = arith.constant 0 : index
    %c0_2 = arith.constant 0 : index
    %1 = vector.load %arg1[%c0_1, %c0_2] : memref<32x16xf32, #tpu.memory_space<vmem>>, vector<32x16xf32>
    %cst = arith.constant dense<0.000000e+00> : vector<8x16xf32>
    %2 = tpu.matmul %0, %1, %cst {dimension_numbers = #tpu.dot_dimension_numbers<[1], [0], [0], [1], [0, 0, 1, 1], [], []>} : vector<8x32xf32>, vector<32x16xf32>, vector<8x16xf32> -> vector<8x16xf32>
    %c0_3 = arith.constant 0 : index
    %c0_4 = arith.constant 0 : index
    %3 = vector.load %arg2[%c0_3, %c0_4] : memref<1x16xf32, #tpu.memory_space<vmem>>, vector<1x16xf32>
    %4 = vector.broadcast %3 : vector<1x16xf32> to vector<8x16xf32>
    %5 = arith.addf %2, %4 : vector<8x16xf32>
    %c0_5 = arith.constant 0 : index
    %c0_6 = arith.constant 0 : index
    %6 = vector.load %arg3[%c0_5, %c0_6] : memref<8x16xf32, #tpu.memory_space<vmem>>, vector<8x16xf32>
    tpu.vector_store %arg3[%c0_5, %c0_6], %5 {strides = array<i32>} : memref<8x16xf32, #tpu.memory_space<vmem>>, vector<8x16xf32>,
    return
  }
}

</mosaic_0001>

<bundles_post_ra>
// kernel: tpu_custom_call.1
= control target key start
LH: loop header
LB: loop body
LE: loop exit
PB: predicated region body
PF: predicated region fallthrough
CT: control target
= control target key end

     0   :  { %v160_v1 = vmov 0.0   ;;  %vm161_vm0 = vmmov 0   ;;  %s204_s0 = inlined_call_operand.vmem [shape: f32[8,32], index: 0, kind: input, shape index: {}]   ;;  %s205_s1 = inlined_call_operand.vmem [shape: f32[32,16], index: 1, kind: input, shape index: {}]   ;;  %s206_s2 = inlined_call_operand.vmem [shape: f32[1,16], index: 2, kind: input, shape index: {}]   ;;  %s207_s3 = inlined_call_operand.hbm [shape: f32[8,16], index: 3, kind: output, shape index: {}]  }
   0x1   :  { %v19_v0 = vld [vmem:[%s205_s1 + $0x18] sm:$0xff]  ;;  %124 = vmatprep.subr.mxu0 %v160_v1  ;;  %v18_v2 = vld [vmem:[%s205_s1 + $0x10] sm:$0xff]  ;;  %132 = vmatprep.mubr.msk.f32.mxu0 %vm161_vm0, %v160_v1 }
   0x2   :  { %125 = vmatpush3.msra.mxu0 %v19_v0 }
   0x3   :  { %8 = vsyncpa [#allocation3], 0  ;;  %126 = vmatprep.subr.mxu0 %v160_v1  ;;  %v17_v3 = vld [vmem:[%s205_s1 + $0x8] sm:$0xff]  ;;  %v16_v4 = vld [vmem:[%s205_s1] sm:$0xff]  ;;  %vm27_vm1 = vcmask 261120   ;;  %s162_s24 = smov [#allocation2]  }
   0x4   :  { %127 = vmatpush3.msra.mxu0 %v18_v2  ;;  %v15_v5 = vld [vmem:[%s204_s0] sm:$0xff]  ;;  %s109_s25 = sshll.u32 %s162_s24, 4  ;;  %vm101_vm2 = vcmask 130048   ;;  %s110_s25 = int_to_ptr.vmem [resolvable:$true] %s109_s25 }
   0x5   :  { %128 = vmatprep.subr.mxu0 %v160_v1  ;;  %v117_v6 = vld [vmem:[%s206_s2] ss:$0 sm:$0xff]  ;;  %s138_s1 = scalar_lea.vmem %s110_s25, 128  ;;  %p143_p1 = scmp.lt.s32.totalorder %s110_s25, %s110_s25 }
   0x6   :  { %129 = vmatpush3.msra.mxu0 %v17_v3  ;;  %p139_p0 = scmp.ne.s32.totalorder %s110_s25, %s138_s1  ;;  %p144_p2 = scmp.lt.s32.totalorder %s138_s1, %s138_s1 }
   0x7   :  { %130 = vmatprep.subr.mxu0 %v160_v1 }
   0x8   :  { %131 = vmatpush3.msra.mxu0 %v16_v4  ;;  %p145_p3 = por %p144_p2, %p143_p1 }
   0x9   :  { %133 = vmatmul.mubr.msk.f32.vlgmr.msra.gmra.mxu0 %vm27_vm1, %v15_v5 }
   0xa   :  { %p146_p4 = pnand %p145_p3, %p139_p0 }
  0xc9   :  { %v97_v7 = vpop.f32.mrf.mxu0 }
  0xca   :  { %v98_v8 = vadd.f32 %v117_v6, %v97_v7 }
  0xcb   :  { %v134_v9 = vpop.f32.mrf.mxu0 }
  0xcc   :  { %102 = vst.msk [vmem:[#allocation2] sm:$0xff] %vm101_vm2, %v98_v8 }
  0xcd   :  { %149 = shalt.err (!%p146_p4)
}
  0xce   :  { %112 = dma.vmem_to_hbm [thread:$0]  %s110_s25, 128, %s207_s3, [#allocation3]  }
  0xcf   :  { %158 = dma.done.wait [#allocation3], 128  }
  0xd0   :  { %159 = vsyncadd [#allocation3], 4294967168 }
  0xd1   :  { %116 = vsyncpa [#allocation3], 1 }

</bundles_post_ra>
